<compile_context>
chip_gen: v7x
topology: tpu7x:2x2x1
jax: 0.10.0
libtpu: 0.0.40
codegen_flags: <defaults>
</compile_context>

<pallas_src>
import functools

import jax
import jax.numpy as jnp
from jax import lax
from jax.experimental import pallas as pl
from jax.experimental.pallas import tpu as pltpu


def _pool_kernel(seq_ref, aux_ref, out_ref, *, mode, mask_zero):
    """Per-block kernel. Block shapes: seq (Bt,T,E), aux (Bt,T) or (Bt,1), out (Bt,E)."""
    seq = seq_ref[...]                                   # (Bt, T, E), native dtype
    Bt, T, E = seq.shape
    f32 = jnp.float32

    if mask_zero:
        mask2d = aux_ref[...].astype(f32)                # (Bt, T)
        seq_len = jnp.sum(mask2d, axis=-1, keepdims=True)  # (Bt, 1)
        mask_b = mask2d[:, :, None] > 0.0                # (Bt, T, 1) bool
        mask_f = mask2d[:, :, None]                      # (Bt, T, 1) f32
    else:
        seq_len = aux_ref[...].astype(f32)               # (Bt, 1)
        # Build the mask directly in the (T sublane, E lane) layout of seq:
        # no 2D->3D relayout / transpose through the XLU.
        pos = lax.broadcasted_iota(jnp.int32, (Bt, T, E), 1).astype(f32)
        mask_b = pos < seq_len[:, :, None]               # (Bt, T, E) bool
        mask_f = mask_b.astype(f32)

    if mode == "max":
        seqf = seq.astype(f32)
        # identical to seq - (1-mask)*1e9 for 0/1 masks, but one vselect.
        masked = jnp.where(mask_b, seqf, seqf - f32(1e9))
        out = jnp.max(masked, axis=1)                    # (Bt, E)
    else:
        # Masked multiply in native dtype (bf16-friendly), accumulate in f32.
        masked = (seq * mask_f.astype(seq.dtype)).astype(f32)
        out = jnp.sum(masked, axis=1)                    # (Bt, E)
        if mode == "mean":
            # approx reciprocal -> EUP slot (free) instead of VPU divide.
            out = out * pl.reciprocal(seq_len + f32(1e-8), approx=True)

    out_ref[...] = out.astype(out_ref.dtype)             # lane-dense (Bt, E) store


def _tpu_vmem_capacity_bytes():
    try:
        return int(pltpu.get_tpu_info().vmem_capacity_bytes)
    except Exception:
        # Conservative fallback = smallest current generation (v7x: 64 MiB / TC).
        return 64 * 1024 * 1024


def sequence_pooling(seq_value, aux, *, mode="mean", mask_zero=False, block_rows=None):
    """Pallas wrapper.

    seq_value: (B, T, E)
    aux      : (B, T) 0/1 mask (mask_zero=True) or (B, 1) float seq_len (mask_zero=False)
    returns  : (B, 1, E)   (same as the PyTorch module)
    """
    if mode not in ("sum", "mean", "max"):
        raise ValueError("mode must be sum, mean or max")
    B, T, E = seq_value.shape

    # ---- generation-aware tile sizing --------------------------------------
    vmem_cap = _tpu_vmem_capacity_bytes()
    # per pipelined input buffer; the pipeline double-buffers it and f32
    # temporaries roughly double it again -> keep well under the scoped limit.
    tile_budget = min(8 * 1024 * 1024, vmem_cap // 12)
    vmem_limit = int(min(vmem_cap // 2, 64 * 1024 * 1024))

    itemsize = jnp.dtype(seq_value.dtype).itemsize
    bytes_per_row = max(1, T * E * itemsize)

    bt = int(block_rows) if block_rows is not None else max(1, tile_budget // bytes_per_row)
    if bt >= B:
        bt = B                                  # single block == full batch dim
    else:
        bt = min(B, max(8, (bt // 8) * 8))      # sublane-aligned blocks ((8,128) rule)
    # TODO(synk): for extremely long sequences where a single (T,E) row exceeds the
    # VMEM budget, add T as an innermost "arbitrary" reduction grid axis with a
    # resident accumulator instead of keeping T whole per block.

    grid = (pl.cdiv(B, bt),)
    kernel = functools.partial(_pool_kernel, mode=mode, mask_zero=mask_zero)

    out2d = pl.pallas_call(
        kernel,
        out_shape=jax.ShapeDtypeStruct((B, E), seq_value.dtype),
        grid=grid,
        in_specs=[
            pl.BlockSpec((bt, T, E), lambda i: (i, 0, 0)),
            pl.BlockSpec((bt, aux.shape[1]), lambda i: (i, 0)),
        ],
        out_specs=pl.BlockSpec((bt, E), lambda i: (i, 0)),
        compiler_params=pltpu.CompilerParams(
            dimension_semantics=("parallel",),   # shards batch across v7x's 2 TCs
            vmem_limit_bytes=vmem_limit,
        ),
    )(seq_value, aux)

    return out2d[:, None, :]                      # (B, 1, E)


# -------------------- pure-JAX reference (PyTorch semantics) --------------------
def _reference(seq_value, aux, mode, mask_zero):
    if mask_zero:
        mask2d = aux.astype(jnp.float32)
        seq_len = jnp.sum(mask2d, axis=-1, keepdims=True)
    else:
        seq_len = aux.astype(jnp.float32)
        row = jnp.arange(seq_value.shape[1], dtype=jnp.float32)[None, :]
        mask2d = (row < seq_len).astype(jnp.float32)
    mask = mask2d[:, :, None]
    if mode == "max":
        v = seq_value - (1.0 - mask) * 1e9
        return jnp.max(v, axis=1, keepdims=True)
    v = jnp.sum(seq_value * mask, axis=1, keepdims=False)
    if mode == "mean":
        v = v / (seq_len + 1e-8)
    return v[:, None, :]


def _check(seq_value, seq_len, mask, block_rows=None):
    B, T, E = seq_value.shape
    ok = True
    for mode in ("sum", "mean", "max"):
        tol = 2e-3 if mode == "mean" else 1e-5   # mean uses approx reciprocal (EUP)
        # mask_zero=False path (seq_len input)
        out = jax.block_until_ready(
            sequence_pooling(seq_value, seq_len, mode=mode, mask_zero=False,
                             block_rows=block_rows))
        ref = _reference(seq_value, seq_len, mode, False)
        ok &= out.shape == (B, 1, E)
        ok &= bool(jnp.allclose(out, ref, atol=tol, rtol=tol))
        # mask_zero=True path (mask input)
        out = jax.block_until_ready(
            sequence_pooling(seq_value, mask, mode=mode, mask_zero=True,
                             block_rows=block_rows))
        ref = _reference(seq_value, mask, mode, True)
        ok &= out.shape == (B, 1, E)
        ok &= bool(jnp.allclose(out, ref, atol=tol, rtol=tol))
    return ok


if __name__ == "__main__":
    key = jax.random.PRNGKey(0)
    k1, k2, k3, k4 = jax.random.split(key, 4)

    ok = True

    # --- small case: whole batch fits one block (grid=(1,)) -----------------
    B, T, E = 4, 8, 32
    seq_value = jax.random.normal(k1, (B, T, E), dtype=jnp.float32)
    lengths = jax.random.randint(k2, (B, 1), 1, T + 1)
    seq_len = lengths.astype(jnp.float32)                            # (B, 1)
    mask = (jnp.arange(T)[None, :] < lengths).astype(jnp.float32)    # (B, T)
    ok &= _check(seq_value, seq_len, mask)

    # --- multi-block case: exercises the batch grid / pipelined DMAs --------
    B, T, E = 24, 16, 128
    seq_value = jax.random.normal(k3, (B, T, E), dtype=jnp.float32)
    lengths = jax.random.randint(k4, (B, 1), 1, T + 1)
    seq_len = lengths.astype(jnp.float32)
    mask = (jnp.arange(T)[None, :] < lengths).astype(jnp.float32)
    ok &= _check(seq_value, seq_len, mask, block_rows=8)             # grid=(3,)

    assert ok, "Pallas kernel output mismatch vs reference"
    print("KERNEL_OK")
</pallas_src>

<mosaic_0001>
module attributes {stable_mosaic.version = 11 : i64} {
  func.func @_pool_kernel(%arg0: i32, %arg1: memref<4x8x32xf32, #tpu.memory_space<vmem>>, %arg2: memref<4x1xf32, #tpu.memory_space<vmem>>, %arg3: memref<4x32xf32, #tpu.memory_space<vmem>>) attributes {dimension_semantics = [#tpu.dimension_semantics<parallel>], iteration_bounds = array<i64: 1>, scalar_prefetch = 0 : i64, scratch_operands = 0 : i64, tpu.core_type = #tpu.core_type<tc>, window_params = [{transform_indices = @transform_0, window_bounds = array<i64: 4, 8, 32>}, {transform_indices = @transform_1, window_bounds = array<i64: 4, 1>}, {transform_indices = @transform_2, window_bounds = array<i64: 4, 32>}]} {
    %c0 = arith.constant 0 : index
    %c0_0 = arith.constant 0 : index
    %c0_1 = arith.constant 0 : index
    %0 = vector.load %arg1[%c0, %c0_0, %c0_1] : memref<4x8x32xf32, #tpu.memory_space<vmem>>, vector<4x8x32xf32>
    %c0_2 = arith.constant 0 : index
    %c0_3 = arith.constant 0 : index
    %1 = vector.load %arg2[%c0_2, %c0_3] : memref<4x1xf32, #tpu.memory_space<vmem>>, vector<4x1xf32>
    %2 = tpu.iota {dimensions = array<i32: 1>} : vector<4x8x32xi32>
    %3 = arith.sitofp %2 : vector<4x8x32xi32> to vector<4x8x32xf32>
    %4 = vector.shape_cast %1 : vector<4x1xf32> to vector<4x1x1xf32>
    %5 = vector.broadcast %4 : vector<4x1x1xf32> to vector<4x8x32xf32>
    %6 = arith.cmpf olt, %3, %5 : vector<4x8x32xf32>
    %7 = arith.extui %6 : vector<4x8x32xi1> to vector<4x8x32xi32>
    %8 = arith.sitofp %7 : vector<4x8x32xi32> to vector<4x8x32xf32>
    %9 = arith.mulf %0, %8 : vector<4x8x32xf32>
    %cst = arith.constant dense<0.000000e+00> : vector<4x32xf32>
    %10 = vector.multi_reduction <add>, %9, %cst [1] : vector<4x8x32xf32> to vector<4x32xf32>
    %c0_4 = arith.constant 0 : index
    %c0_5 = arith.constant 0 : index
    %11 = vector.load %arg3[%c0_4, %c0_5] : memref<4x32xf32, #tpu.memory_space<vmem>>, vector<4x32xf32>
    tpu.vector_store %arg3[%c0_4, %c0_5], %10 {strides = array<i32>} : memref<4x32xf32, #tpu.memory_space<vmem>>, vector<4x32xf32>,
    return
  }
  func.func @transform_0(%arg0: i32) -> (i32, i32, i32) {
    %c0_i32 = arith.constant 0 : i32
    %c0_i32_0 = arith.constant 0 : i32
    %c0_i32_1 = arith.constant 0 : i32
    return %arg0, %c0_i32, %c0_i32_0 : i32, i32, i32
  }
  func.func @transform_1(%arg0: i32) -> (i32, i32) {
    %c0_i32 = arith.constant 0 : i32
    %c0_i32_0 = arith.constant 0 : i32
    return %arg0, %c0_i32 : i32, i32
  }
  func.func @transform_2(%arg0: i32) -> (i32, i32) {
    %c0_i32 = arith.constant 0 : i32
    %c0_i32_0 = arith.constant 0 : i32
    return %arg0, %c0_i32 : i32, i32
  }
}

</mosaic_0001>

<bundles_post_ra>
// kernel: tpu_custom_call.1
= control target key start
LH: loop header
LB: loop body
LE: loop exit
PB: predicated region body
PF: predicated region fallthrough
CT: control target
= control target key end

     0   :  { %7 = vsyncpa [#allocation3], 0  ;;  %s279_s0 = inlined_call_operand.hbm [shape: f32[4,8,32], index: 0, kind: input, shape index: {}]   ;;  %s280_s1 = inlined_call_operand.vmem [shape: f32[4,1], index: 1, kind: input, shape index: {}]   ;;  %s281_s2 = inlined_call_operand.hbm [shape: f32[4,32], index: 2, kind: output, shape index: {}]  }
   0x1   :  { %8 = vsyncpa [#allocation4], 0  ;;  %s226_s9 = smov [#allocation2]   ;;  %s178_s13 = scalar_lea.hbm %s279_s0, 512 }
   0x2   :  { %s14_s10 = sshll.u32 %s226_s9, 4  ;;  %p179_p0 = scmp.ne.s32.totalorder %s279_s0, %s178_s13  ;;  %s15_s10 = int_to_ptr.vmem [resolvable:$true] %s14_s10 }
   0x3   :  { %p182_p1 = scmp.lt.u32.totalorder %s178_s13, %s279_s0 }
   0x5   :  { %p184_p2 = pnand %p182_p1, %p179_p0 }
   0x7   :  { %187 = shalt.err (!%p184_p2)
}
   0x8   :  { %s188_s18 = scalar_lea.vmem %s15_s10, 512  ;;  %p193_p4 = scmp.lt.s32.totalorder %s15_s10, %s15_s10 }
   0x9   :  { %p189_p3 = scmp.ne.s32.totalorder %s15_s10, %s188_s18  ;;  %p194_p5 = scmp.lt.s32.totalorder %s188_s18, %s188_s18 }
   0xb   :  { %p195_p6 = por %p194_p5, %p193_p4 }
   0xd   :  { %p196_p7 = pnand %p195_p6, %p189_p3 }
   0xf   :  { %199 = shalt.err (!%p196_p7)
}
  0x10   :  { %s227_s19 = smov 128   ;;  %s228_s20 = smov 8  }
  0x11   :  { %20 = dma.hbm_to_vmem [thread:$0]  %s279_s0, 512, %s15_s10, [#allocation3], %s227_s19, %s227_s19, %s228_s20  }
  0x12   :  { %222 = dma.done.wait [#allocation3], 512  }
  0x13   :  { %223 = vsyncadd [#allocation3], 4294966784  ;;  %v31_v0 = vlaneseq  ;;  %v229_v1 = vmov 0   ;;  %v230_v2 = vmov 1966171168   ;;  %v26_v20 = vld [vmem:[#allocation2] sm:$0xff] }
  0x14   :  { %176 = vset.pattern.permute.xlu0 %v229_v1  ;;  %v44_v3 = vunpack.c.l.s4 %v230_v2  ;;  %177 = vset.pattern.permute.xlu1 %v229_v1  ;;  %v164_v8 = vld.sshfl [vmem:[%s280_s1] sm:$0x33 pattern:$0x75316420]  ;;  %vm107_vm1 = vcmask 261120   ;;  %v231_v21 = vmov 0.0  }
  0x15   :  { %v32_v4 = vshrl.u32 %v31_v0, 7  ;;  %v42_v10 = vcombine.high %v164_v8, %v164_v8  ;;  %v28_v24 = vld [vmem:[#allocation2 + $0x10] sm:$0xff]  ;;  %v27_v28 = vld [vmem:[#allocation2 + $0x8] sm:$0xff]  ;;  %v29_v34 = vld [vmem:[#allocation2 + $0x18] sm:$0xff]  ;;  %vm140_vm5 = vcmask 1041409   ;;  %vm142_vm6 = vcmask 1042434  }
  0x16   :  { %v45_v5 = vunpack.c.0.s8 %v44_v3  ;;  %s232_s0 = smov [#allocation5]   ;;  %vm144_vm7 = vcmask 1043459   ;;  %vm147_vm8 = vcmask 257024  }
  0x17   :  { %v61_v7 = vsub.s32 0, %v32_v4  ;;  %v33_v18 = vcvt.s32.f32 %v32_v4  ;;  %s155_s1 = sshll.u32 %s232_s0, 4  ;;  %s156_s1 = int_to_ptr.vmem [resolvable:$true] %s155_s1 }
  0x18   :  { %v48_v6 = vsub.s32 %v45_v5, %v32_v4  ;;  %s200_s25 = scalar_lea.vmem %s156_s1, 64  ;;  %p205_p9 = scmp.lt.s32.totalorder %s156_s1, %s156_s1 }
  0x19   :  { %p201_p8 = scmp.ne.s32.totalorder %s156_s1, %s200_s25  ;;  %p206_p10 = scmp.lt.s32.totalorder %s200_s25, %s200_s25 }
  0x1a   :  { %v49_v9 = vrot.slane %v164_v8, %v48_v6  ;;  %v56_v13 = vrot.slane %v42_v10, %v48_v6 }
  0x1b   :  { %p207_p11 = por %p206_p10, %p205_p9 }
  0x1c   :  { %v62_v11 = vrot.slane %v49_v9, %v61_v7  ;;  %v57_v12 = vcombine.high %v49_v9, %v49_v9  ;;  %v66_v15 = vrot.slane %v56_v13, %v61_v7  ;;  %v58_v16 = vcombine.high %v56_v13, %v56_v13 }
  0x1d   :  { %p208_p12 = pnand %p207_p11, %p201_p8 }
  0x1e   :  { %76 = vperm.xlu0 %176, %v62_v11   ;;  %v70_v14 = vrot.slane %v57_v12, %v61_v7  ;;  %v74_v17 = vrot.slane %v58_v16, %v61_v7 }
  0x20   :  { %84 = vperm.xlu1 %177, %v70_v14  }
  0x22   :  { %80 = vperm.xlu0 %176, %v66_v15  }
  0x24   :  { %88 = vperm.xlu1 %177, %v74_v17  }
  0x9d   :  { %v77_v19 = vpop.permute.xlu0 %76 }
  0x9e   :  { %vm91_vm0 = vcmp.lt.f32.partialorder %v33_v18, %v77_v19 }
  0x9f   :  { %v165_v22 = vsel %vm91_vm0, 1.0, %v231_v21  ;;  %v85_v23 = vpop.permute.xlu1 %84 }
  0xa0   :  { %v103_v25 = vmul.f32 %v165_v22, %v26_v20  ;;  %vm93_vm2 = vcmp.lt.f32.partialorder %v33_v18, %v85_v23 }
  0xa1   :  { %v167_v26 = vsel %vm93_vm2, 1.0, %v231_v21  ;;  %v81_v27 = vpop.permute.xlu0 %80 }
  0xa2   :  { %v108_v29 = vsel %vm107_vm1, %v103_v25, 0.0  ;;  %v105_v30 = vmul.f32 %v167_v26, %v28_v24  ;;  %vm92_vm3 = vcmp.lt.f32.partialorder %v33_v18, %v81_v27 }
  0xa3   :  { %v109_v31 = vrot.slane %v108_v29, 4  ;;  %v166_v32 = vsel %vm92_vm3, 1.0, %v231_v21  ;;  %v89_v33 = vpop.permute.xlu1 %88 }
  0xa4   :  { %v122_v35 = vsel %vm107_vm1, %v105_v30, 0.0  ;;  %v104_v36 = vmul.f32 %v166_v32, %v27_v28  ;;  %vm94_vm4 = vcmp.lt.f32.partialorder %v33_v18, %v89_v33 }
  0xa5   :  { %v110_v37 = vadd.f32 %v109_v31, %v108_v29  ;;  %v123_v38 = vrot.slane %v122_v35, 4  ;;  %v168_v39 = vsel %vm94_vm4, 1.0, %v231_v21 }
  0xa6   :  { %v115_v40 = vsel %vm107_vm1, %v104_v36, 0.0  ;;  %v106_v41 = vmul.f32 %v168_v39, %v29_v34 }
  0xa7   :  { %v111_v42 = vrot.slane %v110_v37, 2  ;;  %v124_v43 = vadd.f32 %v123_v38, %v122_v35  ;;  %v116_v44 = vrot.slane %v115_v40, 4 }
  0xa8   :  { %v129_v45 = vsel %vm107_vm1, %v106_v41, 0.0 }
  0xa9   :  { %v112_v46 = vadd.f32 %v111_v42, %v110_v37  ;;  %v125_v47 = vrot.slane %v124_v43, 2  ;;  %v117_v48 = vadd.f32 %v116_v44, %v115_v40  ;;  %v130_v49 = vrot.slane %v129_v45, 4 }
  0xab   :  { %v126_v50 = vadd.f32 %v125_v47, %v124_v43  ;;  %v118_v51 = vrot.slane %v117_v48, 2  ;;  %v131_v52 = vadd.f32 %v130_v49, %v129_v45  ;;  %v113_v53 = vrot.slane %v112_v46, 1 }
  0xad   :  { %v119_v54 = vadd.f32 %v118_v51, %v117_v48  ;;  %v132_v55 = vrot.slane %v131_v52, 2  ;;  %v127_v56 = vrot.slane %v126_v50, 1  ;;  %v114_v59 = vadd.f32 %v113_v53, %v112_v46 }
  0xaf   :  { %v120_v57 = vrot.slane %v119_v54, 1  ;;  %v133_v58 = vadd.f32 %v132_v55, %v131_v52  ;;  %v128_v62 = vadd.f32 %v127_v56, %v126_v50 }
  0xb1   :  { %v121_v60 = vadd.f32 %v120_v57, %v119_v54  ;;  %v134_v61 = vrot.slane %v133_v58, 1 }
  0xb3   :  { %v135_v63 = vadd.f32 %v134_v61, %v133_v58  ;;  %v141_v0 = vsel %vm140_vm5, %v121_v60, %v114_v59 }
  0xb4   :  { %v143_v1 = vsel %vm142_vm6, %v128_v62, %v141_v0 }
  0xb5   :  { %v145_v2 = vsel %vm144_vm7, %v135_v63, %v143_v1 }
  0xb6   :  { %148 = vst.msk [vmem:[#allocation5] sm:$0xf] %vm147_vm8, %v145_v2 }
  0xb7   :  { %211 = shalt.err (!%p208_p12)
}
  0xb8   :  { %s212_s28 = scalar_lea.hbm %s281_s2, 64 }
  0xb9   :  { %p213_p13 = scmp.ne.s32.totalorder %s281_s2, %s212_s28  ;;  %p216_p0 = scmp.lt.u32.totalorder %s212_s28, %s281_s2 }
  0xbb   :  { %p218_p1 = pnand %p216_p0, %p213_p13 }
  0xbd   :  { %221 = shalt.err (!%p218_p1)
}
  0xbe   :  { %158 = dma.vmem_to_hbm [thread:$0]  %s156_s1, 64, %s281_s2, [#allocation4]  }
  0xbf   :  { %224 = dma.done.wait [#allocation4], 64  }
  0xc0   :  { %225 = vsyncadd [#allocation4], 4294967232 }
  0xc1   :  { %162 = vsyncpa [#allocation3], 1 }
  0xc2   :  { %163 = vsyncpa [#allocation4], 1 }

</bundles_post_ra>
